<compile_context>
chip_gen: v6e
topology: v6e:2x2x1
jax: 0.10.0
libtpu: 0.0.40
codegen_flags: <defaults>
</compile_context>

<pallas_src>
from functools import partial

import jax
import jax.numpy as jnp
from jax.experimental import pallas as pl
from jax.experimental.pallas import tpu as pltpu

BN_EPS = 1e-5


def _residual_block_kernel(x_ref, wb1_ref, g1_ref, b1_ref,
                           wb2_ref, g2_ref, b2_ref, chp_ref, o_ref, *, img_h):
    NH, WC = x_ref.shape

    x = x_ref[...].astype(jnp.float32)          # (N*H, W*C), lane-dense rows
    chan_p = chp_ref[...]                        # (W*C, W*C), pre-scaled by 1/M

    # Image-boundary row masks for the H-direction shifts (computed once and
    # reused by both convs).  Flat row i is image row (i % H); a rolled value
    # coming from outside the image (padding or the neighbouring image in the
    # flattened N*H axis) is zeroed by the select.
    row = jax.lax.broadcasted_iota(jnp.int32, (NH, WC), 0)
    has_up = (row % img_h) != 0                  # a row above exists in-image
    has_dn = (row % img_h) != (img_h - 1)        # a row below exists in-image

    def conv_band(h, wb_ref):
        """3x3 'same' conv as ONE MXU matmul in (N*H, W*C) layout.

        The dy = +/-1 taps are XLU sublane rolls (masked at image borders);
        the dx taps, channel mixing and W-border padding live in the stacked
        block-banded weight (3*W*C, W*C).  Single bf16 cast of the fused LHS."""
        up = jnp.where(has_up, pltpu.roll(h, shift=1, axis=0), 0.0)
        dn = jnp.where(has_dn, pltpu.roll(h, shift=NH - 1, axis=0), 0.0)
        lhs = jnp.concatenate([up, h, dn], axis=1).astype(jnp.bfloat16)
        return jnp.dot(lhs, wb_ref[...], preferred_element_type=jnp.float32)

    def batchnorm(y, g_ref, b_ref):
        """Training-mode BN: single-pass sum / sum-of-squares over N*H*W.

        Both stats share one channel-projection matmul (projector pre-scaled
        by 1/(N*H*W)), which reduces over the W-interleaved lane groups and
        broadcasts back to all W positions without any lane reshuffles.
        TODO(synk): at scale, use precision=HIGHEST or a two-pass/Welford
        formulation to guard the E[x^2]-E[x]^2 cancellation."""
        stats = jnp.concatenate([jnp.sum(y, axis=0, keepdims=True),
                                 jnp.sum(y * y, axis=0, keepdims=True)], axis=0)
        proj = jnp.dot(stats, chan_p, preferred_element_type=jnp.float32)
        mean, ex2 = proj[0:1, :], proj[1:2, :]
        rstd = jax.lax.rsqrt(ex2 - mean * mean + BN_EPS)
        return (y - mean) * (rstd * g_ref[...]) + b_ref[...]

    # conv1 -> bn1 -> relu
    h1 = jnp.maximum(batchnorm(conv_band(x, wb1_ref), g1_ref, b1_ref), 0.0)
    # conv2 -> bn2
    h2 = batchnorm(conv_band(h1, wb2_ref), g2_ref, b2_ref)
    # residual add (raw lane-dense input, still in registers) + relu
    o_ref[...] = jnp.maximum(h2 + x, 0.0).astype(o_ref.dtype)


def _band_weights(w, W):
    """(3,3,Cin,Cout) HWIO -> (3*W*Cin, W*Cout) stacked block-banded bf16 matrix.

    For each row tap dy, the three dx taps, the Cin->Cout mixing and the zero
    padding at the left/right image borders are folded into one (W*Cin, W*Cout)
    band; the three bands are stacked along K so the whole 3x3 conv becomes a
    single matmul against the lane-concatenated [up | center | down] LHS."""
    bands = []
    for dy in range(3):
        m = sum(jnp.kron(jnp.eye(W, k=1 - dx, dtype=w.dtype), w[dy, dx])
                for dx in range(3))
        bands.append(m)
    return jnp.concatenate(bands, axis=0).astype(jnp.bfloat16)


def residual_block_pallas(x_nchw, w1, g1, b1, w2, g2, b2):
    """x_nchw: (N, C, H, W) like the PyTorch module; conv weights in HWIO."""
    N, C, H, W = x_nchw.shape
    WC, NH = W * C, N * H

    # TODO(synk): at realistic shapes accept NHWC (and bf16) I/O directly --
    # these NCHW<->NHWC transposes are standalone HBM<->HBM passes.
    x = jnp.transpose(x_nchw, (0, 2, 3, 1)).reshape(NH, WC)   # lane-dense rows
    wb1 = _band_weights(w1, W)
    wb2 = _band_weights(w2, W)
    # per-channel affine params tiled to the (W*C) lane layout
    g1t = jnp.tile(g1.astype(jnp.float32), W).reshape(1, WC)
    b1t = jnp.tile(b1.astype(jnp.float32), W).reshape(1, WC)
    g2t = jnp.tile(g2.astype(jnp.float32), W).reshape(1, WC)
    b2t = jnp.tile(b2.astype(jnp.float32), W).reshape(1, WC)
    # channel projector: P[i, j] = 1/(N*H*W) iff i % C == j % C
    # (per-channel reduce + broadcast over the W lane positions, with the mean
    #  scaling folded in so the kernel does no extra multiplies).
    chan_p = jnp.tile(jnp.eye(C, dtype=jnp.float32), (W, W)) / float(N * H * W)

    vmem = pl.BlockSpec(memory_space=pltpu.MemorySpace.VMEM)
    out = pl.pallas_call(
        partial(_residual_block_kernel, img_h=H),
        out_shape=jax.ShapeDtypeStruct((NH, WC), x_nchw.dtype),
        in_specs=[vmem] * 8,
        out_specs=vmem,
        compiler_params=pltpu.CompilerParams(vmem_limit_bytes=32 * 1024 * 1024),
    )(x, wb1, g1t, b1t, wb2, g2t, b2t, chan_p)
    return jnp.transpose(out.reshape(N, H, W, C), (0, 3, 1, 2))   # -> NCHW


def residual_block_ref(x_nchw, w1, g1, b1, w2, g2, b2):
    """Pure-JAX f32 reference with identical semantics (for verification)."""
    x = jnp.transpose(x_nchw, (0, 2, 3, 1)).astype(jnp.float32)

    def conv(y, w):
        return jax.lax.conv_general_dilated(
            y, w, window_strides=(1, 1), padding=((1, 1), (1, 1)),
            dimension_numbers=('NHWC', 'HWIO', 'NHWC'))

    def bn(y, g, b):
        m = jnp.mean(y, axis=(0, 1, 2), keepdims=True)
        v = jnp.mean((y - m) ** 2, axis=(0, 1, 2), keepdims=True)
        return (y - m) / jnp.sqrt(v + BN_EPS) * g + b

    out = jax.nn.relu(bn(conv(x, w1), g1, b1))
    out = bn(conv(out, w2), g2, b2)
    out = jax.nn.relu(out + x)
    return jnp.transpose(out, (0, 3, 1, 2))


if __name__ == "__main__":
    key = jax.random.PRNGKey(0)
    kx, kw1, kg1, kb1, kw2, kg2, kb2 = jax.random.split(key, 7)

    # small shapes consistent with the module; residual path needs Cin == Cout.
    # C=8, W=16 makes the in-kernel minor dim W*C = 128 (one full vreg lane
    # width), so all elementwise work and stores are lane-dense.
    N, C, H, W = 2, 8, 16, 16                       # NCHW, like PyTorch
    x = jax.random.normal(kx, (N, C, H, W), jnp.float32)

    # deterministic synthetic parameters (conv weights in HWIO layout)
    w1 = 0.1 * jax.random.normal(kw1, (3, 3, C, C), jnp.float32)
    w2 = 0.1 * jax.random.normal(kw2, (3, 3, C, C), jnp.float32)
    g1 = 1.0 + 0.1 * jax.random.normal(kg1, (C,), jnp.float32)
    b1 = 0.1 * jax.random.normal(kb1, (C,), jnp.float32)
    g2 = 1.0 + 0.1 * jax.random.normal(kg2, (C,), jnp.float32)
    b2 = 0.1 * jax.random.normal(kb2, (C,), jnp.float32)

    out = jax.jit(residual_block_pallas)(x, w1, g1, b1, w2, g2, b2)
    out = jax.block_until_ready(out)

    ref = residual_block_ref(x, w1, g1, b1, w2, g2, b2)
    assert out.shape == (N, C, H, W), out.shape
    # bf16 MXU conv operands + two BN normalizations give a max abs error of
    # ~1e-2 vs the pure-f32 reference; 3e-2 bounds it comfortably.
    max_err = float(jnp.max(jnp.abs(out - ref)))
    assert jnp.allclose(out, ref, atol=3e-2, rtol=3e-2), max_err
    print("KERNEL_OK")
</pallas_src>

<mosaic_0001>
module attributes {stable_mosaic.version = 11 : i64} {
  func.func @_residual_block_kernel(%arg0: memref<32x128xf32, #tpu.memory_space<vmem>>, %arg1: memref<384x128xbf16, #tpu.memory_space<vmem>>, %arg2: memref<1x128xf32, #tpu.memory_space<vmem>>, %arg3: memref<1x128xf32, #tpu.memory_space<vmem>>, %arg4: memref<384x128xbf16, #tpu.memory_space<vmem>>, %arg5: memref<1x128xf32, #tpu.memory_space<vmem>>, %arg6: memref<1x128xf32, #tpu.memory_space<vmem>>, %arg7: memref<128x128xf32, #tpu.memory_space<vmem>>, %arg8: memref<32x128xf32, #tpu.memory_space<vmem>>) attributes {dimension_semantics = [], scalar_prefetch = 0 : i64, scratch_operands = 0 : i64, tpu.core_type = #tpu.core_type<tc>} {
    %c0 = arith.constant 0 : index
    %c0_0 = arith.constant 0 : index
    %0 = vector.load %arg0[%c0, %c0_0] : memref<32x128xf32, #tpu.memory_space<vmem>>, vector<32x128xf32>
    %c0_1 = arith.constant 0 : index
    %c0_2 = arith.constant 0 : index
    %1 = vector.load %arg7[%c0_1, %c0_2] : memref<128x128xf32, #tpu.memory_space<vmem>>, vector<128x128xf32>
    %2 = tpu.iota {dimensions = array<i32: 0>} : vector<32x128xi32>
    %c16_i32 = arith.constant 16 : i32
    %c0_i32 = arith.constant 0 : i32
    %3 = arith.cmpi eq, %c16_i32, %c0_i32 : i32
    %c1_i32 = arith.constant 1 : i32
    %4 = arith.select %3, %c1_i32, %c16_i32 : i32
    %5 = vector.broadcast %4 : i32 to vector<32x128xi32>
    %6 = arith.remsi %2, %5 : vector<32x128xi32>
    %c0_i32_3 = arith.constant 0 : i32
    %7 = vector.broadcast %c0_i32_3 : i32 to vector<32x128xi32>
    %8 = arith.cmpi ne, %6, %7 : vector<32x128xi32>
    %c0_i32_4 = arith.constant 0 : i32
    %9 = vector.broadcast %c0_i32_4 : i32 to vector<32x128xi32>
    %10 = arith.cmpi slt, %6, %9 : vector<32x128xi32>
    %c0_i32_5 = arith.constant 0 : i32
    %11 = arith.cmpi slt, %4, %c0_i32_5 : i32
    %12 = vector.broadcast %11 : i1 to vector<32x128xi1>
    %13 = vector.broadcast %12 : vector<32x128xi1> to vector<32x128xi1>
    %14 = arith.xori %10, %13 : vector<32x128xi1>
    %15 = arith.andi %14, %8 : vector<32x128xi1>
    %16 = vector.broadcast %4 : i32 to vector<32x128xi32>
    %17 = arith.addi %6, %16 : vector<32x128xi32>
    %18 = arith.select %15, %17, %6 : vector<32x128xi1>, vector<32x128xi32>
    %c0_i32_6 = arith.constant 0 : i32
    %19 = vector.broadcast %c0_i32_6 : i32 to vector<32x128xi32>
    %20 = arith.cmpi ne, %18, %19 : vector<32x128xi32>
    %c16_i32_7 = arith.constant 16 : i32
    %c0_i32_8 = arith.constant 0 : i32
    %21 = arith.cmpi eq, %c16_i32_7, %c0_i32_8 : i32
    %c1_i32_9 = arith.constant 1 : i32
    %22 = arith.select %21, %c1_i32_9, %c16_i32_7 : i32
    %23 = vector.broadcast %22 : i32 to vector<32x128xi32>
    %24 = arith.remsi %2, %23 : vector<32x128xi32>
    %c0_i32_10 = arith.constant 0 : i32
    %25 = vector.broadcast %c0_i32_10 : i32 to vector<32x128xi32>
    %26 = arith.cmpi ne, %24, %25 : vector<32x128xi32>
    %c0_i32_11 = arith.constant 0 : i32
    %27 = vector.broadcast %c0_i32_11 : i32 to vector<32x128xi32>
    %28 = arith.cmpi slt, %24, %27 : vector<32x128xi32>
    %c0_i32_12 = arith.constant 0 : i32
    %29 = arith.cmpi slt, %22, %c0_i32_12 : i32
    %30 = vector.broadcast %29 : i1 to vector<32x128xi1>
    %31 = vector.broadcast %30 : vector<32x128xi1> to vector<32x128xi1>
    %32 = arith.xori %28, %31 : vector<32x128xi1>
    %33 = arith.andi %32, %26 : vector<32x128xi1>
    %34 = vector.broadcast %22 : i32 to vector<32x128xi32>
    %35 = arith.addi %24, %34 : vector<32x128xi32>
    %36 = arith.select %33, %35, %24 : vector<32x128xi1>, vector<32x128xi32>
    %c15_i32 = arith.constant 15 : i32
    %37 = vector.broadcast %c15_i32 : i32 to vector<32x128xi32>
    %38 = arith.cmpi ne, %36, %37 : vector<32x128xi32>
    %c1_i32_13 = arith.constant 1 : i32
    %39 = tpu.dynamic_rotate %0 by %c1_i32_13 dim 0 : vector<32x128xf32>, i32 -> vector<32x128xf32>
    %cst = arith.constant 0.000000e+00 : f32
    %40 = vector.broadcast %cst : f32 to vector<32x128xf32>
    %41 = arith.select %20, %39, %40 : vector<32x128xi1>, vector<32x128xf32>
    %c31_i32 = arith.constant 31 : i32
    %42 = tpu.dynamic_rotate %0 by %c31_i32 dim 0 : vector<32x128xf32>, i32 -> vector<32x128xf32>
    %cst_14 = arith.constant 0.000000e+00 : f32
    %43 = vector.broadcast %cst_14 : f32 to vector<32x128xf32>
    %44 = arith.select %38, %42, %43 : vector<32x128xi1>, vector<32x128xf32>
    %45 = tpu.concatenate %41, %0, %44 in 1 : vector<32x128xf32>, vector<32x128xf32>, vector<32x128xf32> -> vector<32x384xf32>
    %46 = arith.truncf %45 : vector<32x384xf32> to vector<32x384xbf16>
    %c0_15 = arith.constant 0 : index
    %c0_16 = arith.constant 0 : index
    %47 = vector.load %arg1[%c0_15, %c0_16] : memref<384x128xbf16, #tpu.memory_space<vmem>>, vector<384x128xbf16>
    %cst_17 = arith.constant dense<0.000000e+00> : vector<32x128xf32>
    %48 = tpu.matmul %46, %47, %cst_17 {dimension_numbers = #tpu.dot_dimension_numbers<[1], [0], [0], [1], [0, 0, 1, 1], [], []>} : vector<32x384xbf16>, vector<384x128xbf16>, vector<32x128xf32> -> vector<32x128xf32>
    %cst_18 = arith.constant dense<0.000000e+00> : vector<128xf32>
    %49 = vector.multi_reduction <add>, %48, %cst_18 [0] : vector<32x128xf32> to vector<128xf32>
    %50 = vector.shape_cast %49 : vector<128xf32> to vector<1x128xf32>
    %51 = arith.mulf %48, %48 : vector<32x128xf32>
    %cst_19 = arith.constant dense<0.000000e+00> : vector<128xf32>
    %52 = vector.multi_reduction <add>, %51, %cst_19 [0] : vector<32x128xf32> to vector<128xf32>
    %53 = vector.shape_cast %52 : vector<128xf32> to vector<1x128xf32>
    %54 = tpu.concatenate %50, %53 in 0 : vector<1x128xf32>, vector<1x128xf32> -> vector<2x128xf32>
    %cst_20 = arith.constant dense<0.000000e+00> : vector<2x128xf32>
    %55 = tpu.matmul %54, %1, %cst_20 {dimension_numbers = #tpu.dot_dimension_numbers<[1], [0], [0], [1], [0, 0, 1, 1], [], []>} : vector<2x128xf32>, vector<128x128xf32>, vector<2x128xf32> -> vector<2x128xf32>
    %56 = vector.extract_strided_slice %55 {offsets = [0, 0], sizes = [1, 128], strides = [1, 1]} : vector<2x128xf32> to vector<1x128xf32>
    %57 = vector.extract_strided_slice %55 {offsets = [1, 0], sizes = [1, 128], strides = [1, 1]} : vector<2x128xf32> to vector<1x128xf32>
    %58 = arith.mulf %56, %56 : vector<1x128xf32>
    %59 = arith.subf %57, %58 : vector<1x128xf32>
    %cst_21 = arith.constant 9.99999974E-6 : f32
    %60 = vector.broadcast %cst_21 : f32 to vector<1x128xf32>
    %61 = arith.addf %59, %60 : vector<1x128xf32>
    %62 = math.rsqrt %61 : vector<1x128xf32>
    %63 = vector.broadcast %56 : vector<1x128xf32> to vector<32x128xf32>
    %64 = arith.subf %48, %63 : vector<32x128xf32>
    %c0_22 = arith.constant 0 : index
    %c0_23 = arith.constant 0 : index
    %65 = vector.load %arg2[%c0_22, %c0_23] : memref<1x128xf32, #tpu.memory_space<vmem>>, vector<1x128xf32>
    %66 = arith.mulf %62, %65 : vector<1x128xf32>
    %67 = vector.broadcast %66 : vector<1x128xf32> to vector<32x128xf32>
    %68 = arith.mulf %64, %67 : vector<32x128xf32>
    %c0_24 = arith.constant 0 : index
    %c0_25 = arith.constant 0 : index
    %69 = vector.load %arg3[%c0_24, %c0_25] : memref<1x128xf32, #tpu.memory_space<vmem>>, vector<1x128xf32>
    %70 = vector.broadcast %69 : vector<1x128xf32> to vector<32x128xf32>
    %71 = arith.addf %68, %70 : vector<32x128xf32>
    %cst_26 = arith.constant 0.000000e+00 : f32
    %72 = vector.broadcast %cst_26 : f32 to vector<32x128xf32>
    %73 = arith.maximumf %71, %72 : vector<32x128xf32>
    %c1_i32_27 = arith.constant 1 : i32
    %74 = tpu.dynamic_rotate %73 by %c1_i32_27 dim 0 : vector<32x128xf32>, i32 -> vector<32x128xf32>
    %cst_28 = arith.constant 0.000000e+00 : f32
    %75 = vector.broadcast %cst_28 : f32 to vector<32x128xf32>
    %76 = arith.select %20, %74, %75 : vector<32x128xi1>, vector<32x128xf32>
    %c31_i32_29 = arith.constant 31 : i32
    %77 = tpu.dynamic_rotate %73 by %c31_i32_29 dim 0 : vector<32x128xf32>, i32 -> vector<32x128xf32>
    %cst_30 = arith.constant 0.000000e+00 : f32
    %78 = vector.broadcast %cst_30 : f32 to vector<32x128xf32>
    %79 = arith.select %38, %77, %78 : vector<32x128xi1>, vector<32x128xf32>
    %80 = tpu.concatenate %76, %73, %79 in 1 : vector<32x128xf32>, vector<32x128xf32>, vector<32x128xf32> -> vector<32x384xf32>
    %81 = arith.truncf %80 : vector<32x384xf32> to vector<32x384xbf16>
    %c0_31 = arith.constant 0 : index
    %c0_32 = arith.constant 0 : index
    %82 = vector.load %arg4[%c0_31, %c0_32] : memref<384x128xbf16, #tpu.memory_space<vmem>>, vector<384x128xbf16>
    %cst_33 = arith.constant dense<0.000000e+00> : vector<32x128xf32>
    %83 = tpu.matmul %81, %82, %cst_33 {dimension_numbers = #tpu.dot_dimension_numbers<[1], [0], [0], [1], [0, 0, 1, 1], [], []>} : vector<32x384xbf16>, vector<384x128xbf16>, vector<32x128xf32> -> vector<32x128xf32>
    %cst_34 = arith.constant dense<0.000000e+00> : vector<128xf32>
    %84 = vector.multi_reduction <add>, %83, %cst_34 [0] : vector<32x128xf32> to vector<128xf32>
    %85 = vector.shape_cast %84 : vector<128xf32> to vector<1x128xf32>
    %86 = arith.mulf %83, %83 : vector<32x128xf32>
    %cst_35 = arith.constant dense<0.000000e+00> : vector<128xf32>
    %87 = vector.multi_reduction <add>, %86, %cst_35 [0] : vector<32x128xf32> to vector<128xf32>
    %88 = vector.shape_cast %87 : vector<128xf32> to vector<1x128xf32>
    %89 = tpu.concatenate %85, %88 in 0 : vector<1x128xf32>, vector<1x128xf32> -> vector<2x128xf32>
    %cst_36 = arith.constant dense<0.000000e+00> : vector<2x128xf32>
    %90 = tpu.matmul %89, %1, %cst_36 {dimension_numbers = #tpu.dot_dimension_numbers<[1], [0], [0], [1], [0, 0, 1, 1], [], []>} : vector<2x128xf32>, vector<128x128xf32>, vector<2x128xf32> -> vector<2x128xf32>
    %91 = vector.extract_strided_slice %90 {offsets = [0, 0], sizes = [1, 128], strides = [1, 1]} : vector<2x128xf32> to vector<1x128xf32>
    %92 = vector.extract_strided_slice %90 {offsets = [1, 0], sizes = [1, 128], strides = [1, 1]} : vector<2x128xf32> to vector<1x128xf32>
    %93 = arith.mulf %91, %91 : vector<1x128xf32>
    %94 = arith.subf %92, %93 : vector<1x128xf32>
    %cst_37 = arith.constant 9.99999974E-6 : f32
    %95 = vector.broadcast %cst_37 : f32 to vector<1x128xf32>
    %96 = arith.addf %94, %95 : vector<1x128xf32>
    %97 = math.rsqrt %96 : vector<1x128xf32>
    %98 = vector.broadcast %91 : vector<1x128xf32> to vector<32x128xf32>
    %99 = arith.subf %83, %98 : vector<32x128xf32>
    %c0_38 = arith.constant 0 : index
    %c0_39 = arith.constant 0 : index
    %100 = vector.load %arg5[%c0_38, %c0_39] : memref<1x128xf32, #tpu.memory_space<vmem>>, vector<1x128xf32>
    %101 = arith.mulf %97, %100 : vector<1x128xf32>
    %102 = vector.broadcast %101 : vector<1x128xf32> to vector<32x128xf32>
    %103 = arith.mulf %99, %102 : vector<32x128xf32>
    %c0_40 = arith.constant 0 : index
    %c0_41 = arith.constant 0 : index
    %104 = vector.load %arg6[%c0_40, %c0_41] : memref<1x128xf32, #tpu.memory_space<vmem>>, vector<1x128xf32>
    %105 = vector.broadcast %104 : vector<1x128xf32> to vector<32x128xf32>
    %106 = arith.addf %103, %105 : vector<32x128xf32>
    %107 = arith.addf %106, %0 : vector<32x128xf32>
    %cst_42 = arith.constant 0.000000e+00 : f32
    %108 = vector.broadcast %cst_42 : f32 to vector<32x128xf32>
    %109 = arith.maximumf %107, %108 : vector<32x128xf32>
    %c0_43 = arith.constant 0 : index
    %c0_44 = arith.constant 0 : index
    %110 = vector.load %arg8[%c0_43, %c0_44] : memref<32x128xf32, #tpu.memory_space<vmem>>, vector<32x128xf32>
    tpu.vector_store %arg8[%c0_43, %c0_44], %109 {strides = array<i32>} : memref<32x128xf32, #tpu.memory_space<vmem>>, vector<32x128xf32>,
    return
  }
}

</mosaic_0001>

<bundles_post_ra>
// kernel: tile.28
= control target key start
LH: loop header
LB: loop body
LE: loop exit
PB: predicated region body
PF: predicated region fallthrough
CT: control target
= control target key end

     0   :  { %s28_s0 = inlined_call_operand.vmem [shape: f32[8], index: 0, kind: input, shape index: {}]   ;;  %s29_s1 = inlined_call_operand.vmem [shape: f32[16,8], index: 1, kind: output, shape index: {}]  }
   0x1   :  { %v4_v0 = vld [vmem:[%s28_s0] ss:$0 sm:$0xff] }
   0x2   :  { %5 = vst [vmem:[%s29_s1] sm:$0xff] %v4_v0  ;;  %8 = vst [vmem:[%s29_s1 + $0x8] sm:$0xff] %v4_v0 }

// kernel: tile.29
= control target key start
LH: loop header
LB: loop body
LE: loop exit
PB: predicated region body
PF: predicated region fallthrough
CT: control target
= control target key end

     0   :  { %s133_s10 = smov 120   ;;  %s134_s11 = smov 104   ;;  %vm3_vm0 = vcmask 64512   ;;  %vm9_vm1 = vcmask 1048512   ;;  %vm15_vm2 = vcmask 982912   ;;  %vm21_vm3 = vcmask 917312   ;;  %s209_s0 = inlined_call_operand.vmem [shape: f32[16,8], index: 0, kind: input, shape index: {}]   ;;  %s210_s1 = inlined_call_operand.vmem [shape: f32[1,128], index: 1, kind: output, shape index: {}]  }
   0x1   :  { %v103_v0 = vld [vmem:[%s209_s0 + $0xf] sm:$0x1]   ;;  %v105_v1 = vld [vmem:[%s209_s0 + $0xd] sm:$0x1]   ;;  %v104_v2 = vld [vmem:[%s209_s0 + $0xe] sm:$0x1]  }
   0x2   :  { %7 = vrot.lane.b32.xlu0 %v103_v0, %s133_s10  ;;  %19 = vrot.lane.b32.xlu1 %v105_v1, %s134_s11  ;;  %v106_v3 = vld [vmem:[%s209_s0 + $0xc] sm:$0x1]   ;;  %s135_s16 = smov 112   ;;  %s136_s17 = smov 96   ;;  %v107_v4 = vld [vmem:[%s209_s0 + $0xb] sm:$0x1]  }
   0x3   :  { %v108_v5 = vld [vmem:[%s209_s0 + $0xa] sm:$0x1]   ;;  %v2_v6 = vld [vmem:[%s209_s0] sm:$0x1]   ;;  %s137_s24 = smov 88   ;;  %s138_s25 = smov 80  }
   0x4   :  { %4 = vst.msk [vmem:[#allocation0] sm:$0x1] %vm3_vm0, %v2_v6   ;;  %v109_v7 = vld [vmem:[%s209_s0 + $0x9] sm:$0x1]   ;;  %v110_v8 = vld [vmem:[%s209_s0 + $0x8] sm:$0x1]  }
   0x5   :  { %s139_s30 = smov 72   ;;  %s140_s2 = smov 64   ;;  %v111_v9 = vld [vmem:[%s209_s0 + $0x7] sm:$0x1]   ;;  %v112_v10 = vld [vmem:[%s209_s0 + $0x6] sm:$0x1]  }
   0x6   :  { %13 = vrot.lane.b32.xlu0 %v104_v2, %s135_s16  ;;  %25 = vrot.lane.b32.xlu1 %v106_v3, %s136_s17  ;;  %s141_s7 = smov 56   ;;  %s142_s8 = smov 48   ;;  %v113_v11 = vld [vmem:[%s209_s0 + $0x5] sm:$0x1]   ;;  %v114_v12 = vld [vmem:[%s209_s0 + $0x4] sm:$0x1]  }
   0x7   :  { %s143_s13 = smov 40   ;;  %s144_s14 = smov 32   ;;  %v115_v13 = vld [vmem:[%s209_s0 + $0x3] sm:$0x1]   ;;  %v116_v14 = vld [vmem:[%s209_s0 + $0x2] sm:$0x1]  }
   0x8   :  { %s145_s19 = smov 24   ;;  %s146_s20 = smov 16   ;;  %v117_v15 = vld [vmem:[%s209_s0 + $0x1] sm:$0x1]   ;;  %vm27_vm4 = vcmask 851712   ;;  %vm33_vm5 = vcmask 786112  }
   0x9   :  { %s147_s0 = smov 8   ;;  %vm39_vm6 = vcmask 720512   ;;  %vm45_vm7 = vcmask 654912   ;;  %vm51_vm8 = vcmask 589312   ;;  %vm57_vm9 = vcmask 523712  }
   0xa   :  { %31 = vrot.lane.b32.xlu0 %v107_v4, %s137_s24  ;;  %37 = vrot.lane.b32.xlu1 %v108_v5, %s138_s25  ;;  %vm63_vm10 = vcmask 458112   ;;  %vm69_vm11 = vcmask 392512   ;;  %vm75_vm12 = vcmask 326912   ;;  %vm81_vm13 = vcmask 261312  }
   0xb   :  { %vm87_vm14 = vcmask 195712   ;;  %vm93_vm15 = vcmask 130112  }
   0xe   :  { %43 = vrot.lane.b32.xlu0 %v109_v7, %s139_s30  ;;  %49 = vrot.lane.b32.xlu1 %v110_v8, %s140_s2 }
  0x12   :  { %55 = vrot.lane.b32.xlu0 %v111_v9, %s141_s7  ;;  %61 = vrot.lane.b32.xlu1 %v112_v10, %s142_s8 }
  0x16   :  { %67 = vrot.lane.b32.xlu0 %v113_v11, %s143_s13  ;;  %73 = vrot.lane.b32.xlu1 %v114_v12, %s144_s14 }
  0x1a   :  { %79 = vrot.lane.b32.xlu0 %v115_v13, %s145_s19  ;;  %85 = vrot.lane.b32.xlu1 %v116_v14, %s146_s20 }
  0x1e   :  { %91 = vrot.lane.b32.xlu0 %v117_v15, %s147_s0 }
  0x74   :  { %v8_v16 = vpop.permute.xlu0 %7   ;;  %v20_v17 = vpop.permute.xlu1 %19  }
  0x75   :  { %10 = vst.msk [vmem:[#allocation0] sm:$0x1] %vm9_vm1, %v8_v16  }
  0x78   :  { %v14_v18 = vpop.permute.xlu0 %13   ;;  %v26_v19 = vpop.permute.xlu1 %25  }
  0x79   :  { %16 = vst.msk [vmem:[#allocation0] sm:$0x1] %vm15_vm2, %v14_v18  }
  0x7a   :  { %22 = vst.msk [vmem:[#allocation0] sm:$0x1] %vm21_vm3, %v20_v17  }
  0x7b   :  { %28 = vst.msk [vmem:[#allocation0] sm:$0x1] %vm27_vm4, %v26_v19  }
  0x7c   :  { %v32_v20 = vpop.permute.xlu0 %31   ;;  %v38_v21 = vpop.permute.xlu1 %37  }
  0x7d   :  { %34 = vst.msk [vmem:[#allocation0] sm:$0x1] %vm33_vm5, %v32_v20  }
  0x7e   :  { %40 = vst.msk [vmem:[#allocation0] sm:$0x1] %vm39_vm6, %v38_v21  }
  0x80   :  { %v44_v22 = vpop.permute.xlu0 %43   ;;  %v50_v23 = vpop.permute.xlu1 %49  }
  0x81   :  { %46 = vst.msk [vmem:[#allocation0] sm:$0x1] %vm45_vm7, %v44_v22  }
  0x82   :  { %52 = vst.msk [vmem:[#allocation0] sm:$0x1] %vm51_vm8, %v50_v23  }
  0x84   :  { %v56_v24 = vpop.permute.xlu0 %55   ;;  %v62_v25 = vpop.permute.xlu1 %61  }
  0x85   :  { %58 = vst.msk [vmem:[#allocation0] sm:$0x1] %vm57_vm9, %v56_v24  }
  0x86   :  { %64 = vst.msk [vmem:[#allocation0] sm:$0x1] %vm63_vm10, %v62_v25  }
  0x88   :  { %v68_v26 = vpop.permute.xlu0 %67   ;;  %v74_v27 = vpop.permute.xlu1 %73  }
  0x89   :  { %70 = vst.msk [vmem:[#allocation0] sm:$0x1] %vm69_vm11, %v68_v26  }
  0x8a   :  { %76 = vst.msk [vmem:[#allocation0] sm:$0x1] %vm75_vm12, %v74_v27  }
  0x8c   :  { %v80_v28 = vpop.permute.xlu0 %79   ;;  %v86_v29 = vpop.permute.xlu1 %85  }
  0x8d   :  { %82 = vst.msk [vmem:[#allocation0] sm:$0x1] %vm81_vm13, %v80_v28  }
  0x8e   :  { %88 = vst.msk [vmem:[#allocation0] sm:$0x1] %vm87_vm14, %v86_v29  }
  0x90   :  { %v92_v30 = vpop.permute.xlu0 %91  }
  0x91   :  { %94 = vst.msk [vmem:[#allocation0] sm:$0x1] %vm93_vm15, %v92_v30  }
  0x98   :  { %v99_v31 = vld [vmem:[#allocation0] sm:$0x1] }
  0x99   :  { %102 = vst [vmem:[%s210_s1] sm:$0x1] %v99_v31 }

// kernel: residual_block_pallas.1
= control target key start
LH: loop header
LB: loop body
LE: loop exit
PB: predicated region body
PF: predicated region fallthrough
CT: control target
= control target key end

     0   :  { %v50_v8 = vlaneseq  ;;  %vm1395_vm3 = vmmov 1   ;;  %vm1397_vm11 = vmmov 0   ;;  %vm455_vm12 = vcmask 1040384   ;;  %s1913_s1 = inlined_call_operand.vmem [shape: bf16[384,128], index: 1, kind: input, shape index: {}]   ;;  %s1914_s0 = inlined_call_operand.vmem [shape: f32[32,128], index: 0, kind: input, shape index: {}]   ;;  %s1915_s7 = inlined_call_operand.vmem [shape: f32[128,128], index: 7, kind: input, shape index: {}]   ;;  %s1916_s4 = inlined_call_operand.vmem [shape: bf16[384,128], index: 4, kind: input, shape index: {}]   ;;  %s1917_s2 = inlined_call_operand.vmem [shape: f32[1,128], index: 2, kind: input, shape index: {}]   ;;  %s1918_s3 = inlined_call_operand.vmem [shape: f32[1,128], index: 3, kind: input, shape index: {}]   ;;  %s1919_s5 = inlined_call_operand.vmem [shape: f32[1,128], index: 5, kind: input, shape index: {}]   ;;  %s1920_s6 = inlined_call_operand.vmem [shape: f32[1,128], index: 6, kind: input, shape index: {}]   ;;  %s1921_s8 = inlined_call_operand.vmem [shape: f32[32,128], index: 8, kind: output, shape index: {}]  }
   0x1   :  { %v1343_v0 = vld [vmem:[%s1913_s1 + $0x78] sm:$0xff]   ;;  %v1346_v3 = vld [vmem:[%s1913_s1 + $0x70] sm:$0xff]   ;;  %v1349_v6 = vld [vmem:[%s1913_s1 + $0x68] sm:$0xff]  }
   0x2   :  { %v1344_v1 = vld [vmem:[%s1913_s1 + $0xb8] sm:$0xff]   ;;  %1120 = vmatprep.subr.bf16.mxu0 %v1343_v0  ;;  %v1347_v4 = vld [vmem:[%s1913_s1 + $0xb0] sm:$0xff]   ;;  %v1350_v7 = vld [vmem:[%s1913_s1 + $0xa8] sm:$0xff]   ;;  %v1479_v13 = vshrl.u32 %v50_v8, 7  ;;  %v1396_v0 = vmov 0.0  }
   0x3   :  { %v1345_v2 = vld [vmem:[%s1913_s1 + $0x38] sm:$0xff]   ;;  %1230 = vmatprep.subr.bf16.mxu1 %v1344_v1  ;;  %v1348_v5 = vld [vmem:[%s1913_s1 + $0x30] sm:$0xff]   ;;  %v1351_v9 = vld [vmem:[%s1913_s1 + $0x28] sm:$0xff]  }
   0x4   :  { %1121 = vmatpush3.bf16.msra.mxu0 %v1345_v2  ;;  %1231 = vmatpush3.bf16.msra.mxu1 %v1344_v1  ;;  %v1352_v10 = vld [vmem:[%s1913_s1 + $0x60] sm:$0xff]   ;;  %v1355_v14 = vld [vmem:[%s1913_s1 + $0x58] sm:$0xff]   ;;  %v52_v17 = vadd.s32 8, %v1479_v13  ;;  %v1358_v18 = vld [vmem:[%s1913_s1 + $0x50] sm:$0xff]   ;;  %v54_v23 = vadd.s32 24, %v1479_v13  ;;  %vm128_vm0 = vcmp.lt.s32.totalorder %v1479_v13, 7 }
   0x5   :  { %1122 = vmatprep.subr.bf16.mxu0 %v1346_v3  ;;  %1232 = vmatprep.subr.bf16.mxu1 %v1347_v4  ;;  %v1353_v11 = vld [vmem:[%s1913_s1 + $0xa0] sm:$0xff]   ;;  %v1356_v15 = vld [vmem:[%s1913_s1 + $0x98] sm:$0xff]   ;;  %v1359_v19 = vld [vmem:[%s1913_s1 + $0x90] sm:$0xff]   ;;  %v59_v26 = vand.u32 15, %v1479_v13  ;;  %vm115_vm2 = vcmp.lt.s32.totalorder %v1479_v13, 1  ;;  %v53_v51 = vadd.s32 16, %v1479_v13 }
   0x6   :  { %v1354_v12 = vld [vmem:[%s1913_s1 + $0x20] sm:$0xff]   ;;  %v1357_v16 = vld [vmem:[%s1913_s1 + $0x18] sm:$0xff]   ;;  %v1360_v20 = vld [vmem:[%s1913_s1 + $0x10] sm:$0xff]   ;;  %v66_v21 = vand.u32 15, %v52_v17  ;;  %v80_v31 = vand.u32 15, %v54_v23 }
   0x7   :  { %v1361_v22 = vld [vmem:[%s1913_s1 + $0x48] sm:$0xff]   ;;  %v1515_v27 = vld [vmem:[%s1914_s0] sm:$0xff]  ;;  %v1525_v29 = vld [vmem:[%s1914_s0 + $0x18] sm:$0xff]  ;;  %vm103_vm5 = vcmp.ne.s32.totalorder %v59_v26, 0  ;;  %v73_v59 = vand.u32 15, %v53_v51 }
   0x8   :  { %1123 = vmatpush3.bf16.msra.mxu0 %v1348_v5  ;;  %1233 = vmatpush3.bf16.msra.mxu1 %v1347_v4  ;;  %v1362_v24 = vld [vmem:[%s1913_s1 + $0x88] sm:$0xff]   ;;  %vm1527_vm1 = vcmp.ne.s32.totalorder %v66_v21, 15  ;;  %v1364_v32 = vld [vmem:[%s1913_s1 + $0x40] sm:$0xff]   ;;  %v111_v34 = vrot.slane %v1515_v27, 7  ;;  %v1545_v37 = vld [vmem:[%s1914_s0 + $0x10] sm:$0xff]  ;;  %v124_v38 = vrot.slane %v1515_v27, 1 }
   0x9   :  { %1124 = vmatprep.subr.bf16.mxu0 %v1349_v6  ;;  %1234 = vmatprep.subr.bf16.mxu1 %v1350_v7  ;;  %v1363_v25 = vld [vmem:[%s1913_s1 + $0x8] sm:$0xff]   ;;  %v1365_v33 = vld [vmem:[%s1913_s1 + $0x80] sm:$0xff]   ;;  %v126_v40 = vrot.slane %v1545_v37, 1  ;;  %v114_v41 = vrot.slane %v1525_v29, 7  ;;  %v127_v42 = vrot.slane %v1525_v29, 1  ;;  %vm1564_vm4 = vmpackc.low %vm1527_vm1, %vm1395_vm3  ;;  %vm110_vm6 = vcmp.ne.s32.totalorder %v80_v31, 15 }
   0xa   :  { %v1520_v28 = vld [vmem:[%s1914_s0 + $0x8] sm:$0xff]  ;;  %v1366_v44 = vld [vmem:[%s1913_s1] sm:$0xff]   ;;  %vm1578_vm7 = vmpackc.low %vm1395_vm3, %vm103_vm5  ;;  %v141_v57 = vpack.c.bf16 %v1525_v29, %v1545_v37  ;;  %v113_v58 = vrot.slane %v1545_v37, 7  ;;  %vm105_vm9 = vcmp.ne.s32.totalorder %v73_v59, 0 }
   0xb   :  { %v112_v35 = vrot.slane %v1520_v28, 7  ;;  %v138_v36 = vpack.c.bf16 %v1520_v28, %v1515_v27  ;;  %v125_v39 = vrot.slane %v1520_v28, 1  ;;  %v119_v48 = vsel %vm115_vm2, %v114_v41, %v111_v34  ;;  %vm1583_vm8 = vmpackc.low %vm110_vm6, %vm1395_vm3  ;;  %v1609_v1 = vld [vmem:[%s1915_s7 + $0x78] sm:$0xff]  ;;  %v1616_v2 = vld [vmem:[%s1915_s7 + $0x70] sm:$0xff] }
   0xc   :  { %1125 = vmatpush3.bf16.msra.mxu0 %v1351_v9  ;;  %1235 = vmatpush3.bf16.msra.mxu1 %v1350_v7  ;;  %v129_v50 = vsel %vm128_vm0, %v126_v40, %v127_v42  ;;  %v132_v52 = vsel %vm128_vm0, %v127_v42, %v124_v38  ;;  %v116_v60 = vsel %vm115_vm2, %v113_v58, %v114_v41  ;;  %vm1599_vm10 = vmpackc.low %vm1395_vm3, %vm105_vm9  ;;  %v1623_v3 = vld [vmem:[%s1915_s7 + $0x68] sm:$0xff]  ;;  %v1630_v4 = vld [vmem:[%s1915_s7 + $0x60] sm:$0xff] }
   0xd   :  { %1126 = vmatprep.subr.bf16.mxu0 %v1352_v10  ;;  %1236 = vmatprep.subr.bf16.mxu1 %v1353_v11  ;;  %v118_v43 = vsel %vm115_vm2, %v111_v34, %v112_v35  ;;  %v130_v45 = vsel %vm128_vm0, %v125_v39, %v126_v40  ;;  %v131_v46 = vsel %vm128_vm0, %v124_v38, %v125_v39  ;;  %v1637_v5 = vld [vmem:[%s1915_s7 + $0x58] sm:$0xff]  ;;  %v1644_v6 = vld [vmem:[%s1915_s7 + $0x50] sm:$0xff]  ;;  %v1651_v7 = vld [vmem:[%s1915_s7 + $0x48] sm:$0xff] }
   0xe   :  { %367 = vmatprep.mubr.bf16.mxu0 %v138_v36  ;;  %v1075_v49 = vpack.c.bf16 %v130_v45, %v131_v46  ;;  %v1069_v54 = vpack.c.bf16 %v118_v43, %v119_v48  ;;  %v1078_v55 = vpack.c.bf16 %v132_v52, %v129_v50  ;;  %v117_v61 = vsel %vm115_vm2, %v112_v35, %v113_v58  ;;  %v1658_v8 = vld [vmem:[%s1915_s7 + $0x40] sm:$0xff]  ;;  %v1665_v9 = vld [vmem:[%s1915_s7 + $0x38] sm:$0xff]  ;;  %v1672_v10 = vld [vmem:[%s1915_s7 + $0x30] sm:$0xff] }
   0xf   :  { %v1072_v62 = vpack.c.bf16 %v116_v60, %v117_v61  ;;  %v1714_v17 = vld [vmem:[%s1915_s7] sm:$0xff] }
  0x10   :  { %1127 = vmatpush3.bf16.msra.mxu0 %v1354_v12  ;;  %1237 = vmatpush3.bf16.msra.mxu1 %v1353_v11  ;;  %v1679_v11 = vld [vmem:[%s1915_s7 + $0x28] sm:$0xff]  ;;  %v1686_v12 = vld [vmem:[%s1915_s7 + $0x20] sm:$0xff] }
  0x11   :  { %1128 = vmatprep.subr.bf16.mxu0 %v1355_v14  ;;  %1238 = vmatprep.subr.bf16.mxu1 %v1356_v15  ;;  %v1692_v14 = vld [vmem:[%s1915_s7 + $0x18] sm:$0xff] }
  0x12   :  { %1246 = vmatprep.mubr.msk.bf16.mxu1 %vm1564_vm4, %v1075_v49 }
  0x14   :  { %1129 = vmatpush3.bf16.msra.mxu0 %v1357_v16  ;;  %1239 = vmatpush3.bf16.msra.mxu1 %v1356_v15  ;;  %v1698_v15 = vld [vmem:[%s1915_s7 + $0x10] sm:$0xff]  ;;  %v1707_v16 = vld [vmem:[%s1915_s7 + $0x8] sm:$0xff] }
  0x15   :  { %1130 = vmatprep.subr.bf16.mxu0 %v1358_v18  ;;  %1240 = vmatprep.subr.bf16.mxu1 %v1359_v19 }
  0x18   :  { %1131 = vmatpush3.bf16.msra.mxu0 %v1360_v20  ;;  %1241 = vmatpush3.bf16.msra.mxu1 %v1359_v19 }
  0x19   :  { %1132 = vmatprep.subr.bf16.mxu0 %v1361_v22  ;;  %1242 = vmatprep.subr.bf16.mxu1 %v1362_v24 }
  0x1c   :  { %1133 = vmatpush3.bf16.msra.mxu0 %v1363_v25  ;;  %1243 = vmatpush3.bf16.msra.mxu1 %v1362_v24 }
  0x1d   :  { %1134 = vmatprep.subr.bf16.mxu0 %v1364_v32  ;;  %1244 = vmatprep.subr.bf16.mxu1 %v1365_v33 }
  0x20   :  { %1135 = vmatpush3.bf16.msra.mxu0 %v1366_v44  ;;  %1245 = vmatpush3.bf16.msra.mxu1 %v1365_v33 }
  0x21   :  { %1250 = vmatprep.subr.mxu0 %v1396_v0 }
  0x23   :  { %1070 = vmatmul.mubr.msk.bf16.vlgmr.msra.gmra.mxu0 %vm1578_vm7, %v1069_v54  ;;  %1247 = vmatmul.mubr.msk.bf16.vlgmr.msra.gmra.mxu1 %vm1583_vm8, %v1078_v55 }
  0x24   :  { %375 = vmatprep.mubr.bf16.mxu0 %v141_v57  ;;  %1251 = vmatpush3.msra.mxu0 %v1609_v1 }
  0x25   :  { %1252 = vmatprep.subr.mxu0 %v1396_v0 }
  0x26   :  { %1253 = vmatpush3.msra.mxu0 %v1616_v2 }
  0x27   :  { %1254 = vmatprep.subr.mxu0 %v1396_v0 }
  0x28   :  { %1255 = vmatpush3.msra.mxu0 %v1623_v3 }
  0x29   :  { %1256 = vmatprep.subr.mxu0 %v1396_v0 }
  0x2a   :  { %1257 = vmatpush3.msra.mxu0 %v1630_v4 }
  0x2b   :  { %1073 = vmatmul.mubr.msk.bf16.gmra.mxu0 %vm1599_vm10, %v1072_v62  ;;  %1258 = vmatprep.subr.mxu0 %v1396_v0 }
  0x2c   :  { %1259 = vmatpush3.msra.mxu0 %v1637_v5  ;;  %1282 = vmatprep.mubr.msk.f32.mxu0 %vm1397_vm11, %v1396_v0 }
  0x2d   :  { %1260 = vmatprep.subr.mxu0 %v1396_v0 }
  0x2e   :  { %1261 = vmatpush3.msra.mxu0 %v1644_v6 }
  0x2f   :  { %1262 = vmatprep.subr.mxu0 %v1396_v0 }
  0x30   :  { %1263 = vmatpush3.msra.mxu0 %v1651_v7 }
  0x31   :  { %1264 = vmatprep.subr.mxu0 %v1396_v0 }
  0x32   :  { %1265 = vmatpush3.msra.mxu0 %v1658_v8 }
  0x33   :  { %1266 = vmatprep.subr.mxu0 %v1396_v0 }
  0x34   :  { %1267 = vmatpush3.msra.mxu0 %v1665_v9 }
  0x35   :  { %1268 = vmatprep.subr.mxu0 %v1396_v0 }
  0x36   :  { %1269 = vmatpush3.msra.mxu0 %v1672_v10 }
  0x37   :  { %1270 = vmatprep.subr.mxu0 %v1396_v0 }
  0x38   :  { %1271 = vmatpush3.msra.mxu0 %v1679_v11 }
  0x39   :  { %1272 = vmatprep.subr.mxu0 %v1396_v0 }
  0x3a   :  { %1273 = vmatpush3.msra.mxu0 %v1686_v12 }
  0x3b   :  { %1274 = vmatprep.subr.mxu0 %v1396_v0 }
  0x3c   :  { %1275 = vmatpush3.msra.mxu0 %v1692_v14 }
  0x3d   :  { %1276 = vmatprep.subr.mxu0 %v1396_v0 }
  0x3e   :  { %1277 = vmatpush3.msra.mxu0 %v1698_v15 }
  0x3f   :  { %1278 = vmatprep.subr.mxu0 %v1396_v0 }
  0x40   :  { %1279 = vmatpush3.msra.mxu0 %v1707_v16 }
  0x41   :  { %1280 = vmatprep.subr.mxu0 %v1396_v0 }
  0x42   :  { %1281 = vmatpush3.msra.mxu0 %v1714_v17 }
  0xe3   :  { %v1136_v18 = vpop.f32.mrf.mxu0  ;;  %v1248_v19 = vpop.f32.mrf.mxu1 }
  0xe5   :  { %v1137_v20 = vpop.f32.mrf.mxu0  ;;  %v418_v21 = vpop.f32.mrf.mxu1 }
  0xe6   :  { %v1138_v25 = vadd.f32 %v1137_v20, %v1136_v18 }
  0xe7   :  { %v1139_v22 = vpop.f32.mrf.mxu0  ;;  %v1249_v23 = vpop.f32.mrf.mxu1 }
  0xe8   :  { %v1721_v34 = vadd.f32 %v1138_v25, %v418_v21  ;;  %v1369_v25 = vld [vmem:[%s1916_s4 + $0xb8] sm:$0xff]  }
  0xe9   :  { %v1140_v24 = vpop.f32.mrf.mxu0  ;;  %v421_v30 = vpop.f32.mrf.mxu1  ;;  %1285 = vmatprep.subr.bf16.mxu0 %v1369_v25 }
  0xea   :  { %v1141_v26 = vadd.f32 %v1140_v24, %v1139_v22  ;;  %v442_v41 = vmul.f32 %v1721_v34, %v1721_v34  ;;  %v1368_v24 = vld [vmem:[%s1916_s4 + $0x38] sm:$0xff]  }
  0xeb   :  { %v1142_v31 = vpop.f32.mrf.mxu0 }
  0xec   :  { %v1719_v32 = vadd.f32 %v1141_v26, %v421_v30  ;;  %v1370_v26 = vld [vmem:[%s1916_s4 + $0x70] sm:$0xff]  }
  0xed   :  { %v1143_v33 = vpop.f32.mrf.mxu0  ;;  %v1371_v30 = vld [vmem:[%s1916_s4 + $0x30] sm:$0xff]  }
  0xee   :  { %v1144_v35 = vadd.f32 %v1143_v33, %v1142_v31  ;;  %v443_v38 = vmul.f32 %v1719_v32, %v1719_v32  ;;  %v433_v42 = vadd.f32 %v1719_v32, %v1721_v34  ;;  %v1372_v31 = vld [vmem:[%s1916_s4 + $0xb0] sm:$0xff]   ;;  %v1373_v33 = vld [vmem:[%s1916_s4 + $0x68] sm:$0xff]  }
  0xef   :  { %v1145_v36 = vpop.f32.mrf.mxu0 }
  0xf0   :  { %v1725_v39 = vadd.f32 %v1248_v19, %v1144_v35  ;;  %v446_v45 = vadd.f32 %v443_v38, %v442_v41  ;;  %v1374_v35 = vld [vmem:[%s1916_s4 + $0x28] sm:$0xff]   ;;  %v1376_v38 = vld [vmem:[%s1916_s4 + $0x60] sm:$0xff]  }
  0xf1   :  { %v1146_v40 = vpop.f32.mrf.mxu0  ;;  %v1378_v41 = vld [vmem:[%s1916_s4 + $0xa0] sm:$0xff]  }
  0xf2   :  { %v444_v43 = vmul.f32 %v1725_v39, %v1725_v39  ;;  %v1147_v44 = vadd.f32 %v1146_v40, %v1145_v36  ;;  %v434_v46 = vadd.f32 %v433_v42, %v1725_v39  ;;  %v1375_v36 = vld [vmem:[%s1916_s4 + $0xa8] sm:$0xff]   ;;  %v1377_v40 = vld [vmem:[%s1916_s4 + $0x20] sm:$0xff]   ;;  %v1379_v42 = vld [vmem:[%s1916_s4 + $0x58] sm:$0xff]  }
  0xf4   :  { %v1734_v48 = vadd.f32 %v1249_v23, %v1147_v44  ;;  %v447_v49 = vadd.f32 %v446_v45, %v444_v43  ;;  %v1367_v23 = vld [vmem:[%s1916_s4 + $0x78] sm:$0xff]   ;;  %v1382_v45 = vld [vmem:[%s1916_s4 + $0x50] sm:$0xff]  }
  0xf5   :  { %1175 = vmatprep.subr.bf16.mxu1 %v1367_v23  ;;  %v1380_v43 = vld [vmem:[%s1916_s4 + $0x18] sm:$0xff]  }
  0xf6   :  { %v435_v50 = vadd.f32 %v434_v46, %v1734_v48  ;;  %v445_v51 = vmul.f32 %v1734_v48, %v1734_v48  ;;  %1176 = vmatpush3.bf16.msra.mxu1 %v1368_v24  ;;  %v1381_v44 = vld [vmem:[%s1916_s4 + $0x98] sm:$0xff]   ;;  %v1383_v46 = vld [vmem:[%s1916_s4 + $0x10] sm:$0xff]  }
  0xf7   :  { %1177 = vmatprep.subr.bf16.mxu1 %v1370_v26 }
  0xf8   :  { %v436_v52 = vrot.slane %v435_v50, 4  ;;  %v448_v54 = vadd.f32 %v447_v49, %v445_v51  ;;  %v1384_v49 = vld [vmem:[%s1916_s4 + $0x90] sm:$0xff]   ;;  %v1387_v51 = vld [vmem:[%s1916_s4 + $0x88] sm:$0xff]  }
  0xfa   :  { %v437_v55 = vadd.f32 %v436_v52, %v435_v50  ;;  %v449_v57 = vrot.slane %v448_v54, 4  ;;  %1178 = vmatpush3.bf16.msra.mxu1 %v1371_v30  ;;  %v1385_v50 = vld [vmem:[%s1916_s4 + $0x48] sm:$0xff]  }
  0xfb   :  { %1179 = vmatprep.subr.bf16.mxu1 %v1373_v33  ;;  %v1386_v52 = vld [vmem:[%s1916_s4 + $0x8] sm:$0xff]  }
  0xfc   :  { %v438_v58 = vrot.slane %v437_v55, 2  ;;  %v450_v59 = vadd.f32 %v449_v57, %v448_v54  ;;  %v1388_v54 = vld [vmem:[%s1916_s4 + $0x40] sm:$0xff]  }
  0xfd   :  { %v1390_v57 = vld [vmem:[%s1916_s4 + $0x80] sm:$0xff]  }
  0xfe   :  { %v439_v60 = vadd.f32 %v438_v58, %v437_v55  ;;  %v451_v61 = vrot.slane %v450_v59, 2  ;;  %1180 = vmatpush3.bf16.msra.mxu1 %v1374_v35  ;;  %v1389_v55 = vld [vmem:[%s1916_s4] sm:$0xff]  }
  0xff   :  { %1181 = vmatprep.subr.bf16.mxu1 %v1376_v38  ;;  %v1081_v35 = vld [vmem:[%s1918_s3] ss:$0 sm:$0xff] }
 0x100   :  { %v440_v62 = vrot.slane %v439_v60, 1  ;;  %v452_v18 = vadd.f32 %v451_v61, %v450_v59 }
 0x102   :  { %v453_v19 = vrot.slane %v452_v18, 1  ;;  %v441_v20 = vadd.f32 %v440_v62, %v439_v60  ;;  %1182 = vmatpush3.bf16.msra.mxu1 %v1377_v40 }
 0x103   :  { %1183 = vmatprep.subr.bf16.mxu1 %v1379_v42 }
 0x104   :  { %v454_v21 = vadd.f32 %v453_v19, %v452_v18  ;;  %v536_v19 = vsub.s32 0, %v1479_v13 }
 0x106   :  { %v456_v22 = vsel %vm455_vm12, %v441_v20, %v454_v21  ;;  %1184 = vmatpush3.bf16.msra.mxu1 %v1380_v43  ;;  %v1080_v21 = vld [vmem:[%s1917_s2] ss:$0 sm:$0xff] }
 0x107   :  { %1283 = vmatmul.mubr.f32.vlgmr.msra.gmra.mxu0 %v456_v22  ;;  %1185 = vmatprep.subr.bf16.mxu1 %v1382_v45  ;;  %v552_v22 = vsub.s32 1, %v1479_v13 }
 0x108   :  { %1286 = vmatpush3.bf16.msra.mxu0 %v1369_v25 }
 0x109   :  { %1287 = vmatprep.subr.bf16.mxu0 %v1372_v31 }
 0x10a   :  { %1186 = vmatpush3.bf16.msra.mxu1 %v1383_v46 }
 0x10b   :  { %1187 = vmatprep.subr.bf16.mxu1 %v1385_v50 }
 0x10c   :  { %1288 = vmatpush3.bf16.msra.mxu0 %v1372_v31 }
 0x10d   :  { %1289 = vmatprep.subr.bf16.mxu0 %v1375_v36 }
 0x10e   :  { %1188 = vmatpush3.bf16.msra.mxu1 %v1386_v52 }
 0x10f   :  { %1189 = vmatprep.subr.bf16.mxu1 %v1388_v54 }
 0x110   :  { %1290 = vmatpush3.bf16.msra.mxu0 %v1375_v36 }
 0x111   :  { %1291 = vmatprep.subr.bf16.mxu0 %v1378_v41 }
 0x112   :  { %1190 = vmatpush3.bf16.msra.mxu1 %v1389_v55 }
 0x113   :  { %1305 = vmatprep.subr.mxu1 %v1396_v0 }
 0x114   :  { %1292 = vmatpush3.bf16.msra.mxu0 %v1378_v41 }
 0x115   :  { %1293 = vmatprep.subr.bf16.mxu0 %v1381_v44 }
 0x118   :  { %1294 = vmatpush3.bf16.msra.mxu0 %v1381_v44 }
 0x119   :  { %1295 = vmatprep.subr.bf16.mxu0 %v1384_v49 }
 0x11c   :  { %1296 = vmatpush3.bf16.msra.mxu0 %v1384_v49 }
 0x11d   :  { %1297 = vmatprep.subr.bf16.mxu0 %v1387_v51 }
 0x120   :  { %1298 = vmatpush3.bf16.msra.mxu0 %v1387_v51 }
 0x121   :  { %1299 = vmatprep.subr.bf16.mxu0 %v1390_v57 }
 0x124   :  { %1300 = vmatpush3.bf16.msra.mxu0 %v1390_v57 }
 0x1c7   :  { %v523_v58 = vpop.f32.mrf.mxu0 }
 0x1c8   :  { %v527_v59 = vmul.f32 %v523_v58, %v523_v58  ;;  %v537_v20 = vrot.slane %v523_v58, %v536_v19 }
 0x1c9   :  { %v1284_v60 = vpop.f32.mrf.mxu0 }
 0x1ca   :  { %v529_v61 = vrot.slane %v527_v59, 7  ;;  %v538_v25 = vsub.f32 %v1721_v34, %v537_v20  ;;  %v539_v26 = vsub.f32 %v1719_v32, %v537_v20  ;;  %v540_v30 = vsub.f32 %v1725_v39, %v537_v20 }
 0x1cb   :  { %v541_v31 = vsub.f32 %v1734_v48, %v537_v20 }
 0x1cc   :  { %v531_v62 = vsub.f32 %v523_v58, %v529_v61 }
 0x1ce   :  { %v532_v18 = vadd.f32 1e-05, %v531_v62 }
 0x1d0   :  { %1391 = vrsqrt.f32 %v532_v18 }
 0x1dd   :  { %v1392_v23 = vpop.eup %1391 }
 0x1de   :  { %v549_v24 = vmul.f32 %v1392_v23, %v1080_v21 }
 0x1e0   :  { %v553_v33 = vrot.slane %v549_v24, %v552_v22 }
 0x1e2   :  { %v556_v36 = vmul.f32 %v553_v33, %v540_v30  ;;  %v557_v38 = vmul.f32 %v553_v33, %v541_v31  ;;  %v554_v40 = vmul.f32 %v553_v33, %v538_v25  ;;  %v555_v41 = vmul.f32 %v553_v33, %v539_v26 }
 0x1e4   :  { %v565_v42 = vadd.f32 %v1081_v35, %v554_v40  ;;  %v566_v43 = vadd.f32 %v1081_v35, %v555_v41  ;;  %v567_v34 = vadd.f32 %v1081_v35, %v556_v36  ;;  %v568_v44 = vadd.f32 %v1081_v35, %v557_v38 }
 0x1e6   :  { %v569_v32 = vmax.f32 %v565_v42, 0.0  ;;  %v570_v45 = vmax.f32 %v566_v43, 0.0  ;;  %v572_v39 = vmax.f32 %v568_v44, 0.0  ;;  %v571_v46 = vmax.f32 %v567_v34, 0.0 }
 0x1e8   :  { %v573_v48 = vrot.slane %v569_v32, 7  ;;  %v574_v49 = vrot.slane %v570_v45, 7  ;;  %v598_v50 = vpack.c.bf16 %v570_v45, %v569_v32  ;;  %v576_v51 = vrot.slane %v572_v39, 7 }
 0x1e9   :  { %v585_v52 = vrot.slane %v569_v32, 1  ;;  %v586_v54 = vrot.slane %v570_v45, 1  ;;  %v587_v55 = vrot.slane %v571_v46, 1  ;;  %v588_v59 = vrot.slane %v572_v39, 1 }
 0x1ea   :  { %827 = vmatprep.mubr.bf16.mxu1 %v598_v50  ;;  %v579_v57 = vsel %vm115_vm2, %v573_v48, %v574_v49  ;;  %v580_v58 = vsel %vm115_vm2, %v576_v51, %v573_v48  ;;  %v601_v18 = vpack.c.bf16 %v572_v39, %v571_v46  ;;  %v575_v24 = vrot.slane %v571_v46, 7 }
 0x1eb   :  { %v1107_v60 = vpack.c.bf16 %v579_v57, %v580_v58  ;;  %v590_v61 = vsel %vm128_vm0, %v586_v54, %v587_v55  ;;  %v591_v62 = vsel %vm128_vm0, %v585_v52, %v586_v54  ;;  %v589_v21 = vsel %vm128_vm0, %v587_v55, %v588_v59 }
 0x1ec   :  { %v1113_v20 = vpack.c.bf16 %v590_v61, %v591_v62  ;;  %v592_v23 = vsel %vm128_vm0, %v588_v59, %v585_v52  ;;  %v577_v26 = vsel %vm115_vm2, %v575_v24, %v576_v51  ;;  %v578_v30 = vsel %vm115_vm2, %v574_v49, %v575_v24 }
 0x1ed   :  { %1108 = vmatmul.mubr.msk.bf16.vlgmr.msra.gmra.mxu1 %vm1578_vm7, %v1107_v60  ;;  %v1116_v25 = vpack.c.bf16 %v592_v23, %v589_v21  ;;  %v1110_v47 = vpack.c.bf16 %v577_v26, %v578_v30  ;;  %v1118_v21 = vld [vmem:[%s1919_s5] ss:$0 sm:$0xff] }
 0x1ee   :  { %1301 = vmatprep.mubr.msk.bf16.mxu0 %vm1564_vm4, %v1113_v20  ;;  %835 = vmatprep.mubr.bf16.mxu1 %v601_v18 }
 0x1ef   :  { %1302 = vmatmul.mubr.msk.bf16.vlgmr.msra.gmra.mxu0 %vm1583_vm8, %v1116_v25  ;;  %1306 = vmatpush3.msra.mxu1 %v1609_v1 }
 0x1f0   :  { %1307 = vmatprep.subr.mxu1 %v1396_v0 }
 0x1f1   :  { %1308 = vmatpush3.msra.mxu1 %v1616_v2 }
 0x1f2   :  { %1309 = vmatprep.subr.mxu1 %v1396_v0 }
 0x1f3   :  { %1310 = vmatpush3.msra.mxu1 %v1623_v3 }
 0x1f4   :  { %1311 = vmatprep.subr.mxu1 %v1396_v0 }
 0x1f5   :  { %1111 = vmatmul.mubr.msk.bf16.gmra.mxu1 %vm1599_vm10, %v1110_v47 }
 0x1f6   :  { %1312 = vmatpush3.msra.mxu1 %v1630_v4  ;;  %1337 = vmatprep.mubr.msk.f32.mxu1 %vm1397_vm11, %v1396_v0 }
 0x1f7   :  { %1313 = vmatprep.subr.mxu1 %v1396_v0 }
 0x1f8   :  { %1314 = vmatpush3.msra.mxu1 %v1637_v5 }
 0x1f9   :  { %1315 = vmatprep.subr.mxu1 %v1396_v0 }
 0x1fa   :  { %1316 = vmatpush3.msra.mxu1 %v1644_v6 }
 0x1fb   :  { %1317 = vmatprep.subr.mxu1 %v1396_v0 }
 0x1fc   :  { %1318 = vmatpush3.msra.mxu1 %v1651_v7 }
 0x1fd   :  { %1319 = vmatprep.subr.mxu1 %v1396_v0 }
 0x1fe   :  { %1320 = vmatpush3.msra.mxu1 %v1658_v8 }
 0x1ff   :  { %1321 = vmatprep.subr.mxu1 %v1396_v0 }
 0x200   :  { %1322 = vmatpush3.msra.mxu1 %v1665_v9 }
 0x201   :  { %1323 = vmatprep.subr.mxu1 %v1396_v0 }
 0x202   :  { %1324 = vmatpush3.msra.mxu1 %v1672_v10 }
 0x203   :  { %1325 = vmatprep.subr.mxu1 %v1396_v0 }
 0x204   :  { %1326 = vmatpush3.msra.mxu1 %v1679_v11 }
 0x205   :  { %1327 = vmatprep.subr.mxu1 %v1396_v0 }
 0x206   :  { %1328 = vmatpush3.msra.mxu1 %v1686_v12 }
 0x207   :  { %1329 = vmatprep.subr.mxu1 %v1396_v0 }
 0x208   :  { %1330 = vmatpush3.msra.mxu1 %v1692_v14 }
 0x209   :  { %1331 = vmatprep.subr.mxu1 %v1396_v0 }
 0x20a   :  { %1332 = vmatpush3.msra.mxu1 %v1698_v15 }
 0x20b   :  { %1333 = vmatprep.subr.mxu1 %v1396_v0 }
 0x20c   :  { %1334 = vmatpush3.msra.mxu1 %v1707_v16 }
 0x20d   :  { %1335 = vmatprep.subr.mxu1 %v1396_v0 }
 0x20e   :  { %1336 = vmatpush3.msra.mxu1 %v1714_v17 }
 0x2ad   :  { %v1191_v53 = vpop.f32.mrf.mxu1 }
 0x2af   :  { %v1303_v56 = vpop.f32.mrf.mxu0  ;;  %v1192_v63 = vpop.f32.mrf.mxu1 }
 0x2b0   :  { %v1193_v5 = vadd.f32 %v1192_v63, %v1191_v53 }
 0x2b1   :  { %v878_v1 = vpop.f32.mrf.mxu0  ;;  %v1194_v2 = vpop.f32.mrf.mxu1 }
 0x2b2   :  { %v879_v11 = vadd.f32 %v1193_v5, %v878_v1 }
 0x2b3   :  { %v1304_v3 = vpop.f32.mrf.mxu0  ;;  %v1195_v4 = vpop.f32.mrf.mxu1 }
 0x2b4   :  { %v1196_v6 = vadd.f32 %v1195_v4, %v1194_v2  ;;  %v902_v17 = vmul.f32 %v879_v11, %v879_v11 }
 0x2b5   :  { %v881_v7 = vpop.f32.mrf.mxu0  ;;  %v1197_v8 = vpop.f32.mrf.mxu1 }
 0x2b6   :  { %v882_v9 = vadd.f32 %v1196_v6, %v881_v7 }
 0x2b7   :  { %v1198_v10 = vpop.f32.mrf.mxu1 }
 0x2b8   :  { %v1199_v12 = vadd.f32 %v1198_v10, %v1197_v8  ;;  %v903_v15 = vmul.f32 %v882_v9, %v882_v9  ;;  %v893_v31 = vadd.f32 %v882_v9, %v879_v11 }
 0x2b9   :  { %v1200_v14 = vpop.f32.mrf.mxu1 }
 0x2ba   :  { %v887_v0 = vadd.f32 %v1303_v56, %v1199_v12  ;;  %v906_v36 = vadd.f32 %v903_v15, %v902_v17  ;;  %v1119_v56 = vld [vmem:[%s1920_s6] ss:$0 sm:$0xff] }
 0x2bb   :  { %v1201_v16 = vpop.f32.mrf.mxu1 }
 0x2bc   :  { %v904_v33 = vmul.f32 %v887_v0, %v887_v0  ;;  %v1202_v35 = vadd.f32 %v1201_v16, %v1200_v14  ;;  %v894_v38 = vadd.f32 %v893_v31, %v887_v0 }
 0x2be   :  { %v890_v40 = vadd.f32 %v1304_v3, %v1202_v35  ;;  %v907_v41 = vadd.f32 %v906_v36, %v904_v33 }
 0x2c0   :  { %v895_v42 = vadd.f32 %v894_v38, %v890_v40  ;;  %v905_v43 = vmul.f32 %v890_v40, %v890_v40 }
 0x2c2   :  { %v896_v34 = vrot.slane %v895_v42, 4  ;;  %v908_v44 = vadd.f32 %v907_v41, %v905_v43 }
 0x2c4   :  { %v897_v32 = vadd.f32 %v896_v34, %v895_v42  ;;  %v909_v45 = vrot.slane %v908_v44, 4 }
 0x2c6   :  { %v898_v39 = vrot.slane %v897_v32, 2  ;;  %v910_v46 = vadd.f32 %v909_v45, %v908_v44 }
 0x2c8   :  { %v899_v48 = vadd.f32 %v898_v39, %v897_v32  ;;  %v911_v49 = vrot.slane %v910_v46, 2 }
 0x2ca   :  { %v900_v50 = vrot.slane %v899_v48, 1  ;;  %v912_v51 = vadd.f32 %v911_v49, %v910_v46 }
 0x2cc   :  { %v913_v52 = vrot.slane %v912_v51, 1  ;;  %v901_v54 = vadd.f32 %v900_v50, %v899_v48 }
 0x2ce   :  { %v914_v55 = vadd.f32 %v913_v52, %v912_v51 }
 0x2d0   :  { %v915_v57 = vsel %vm455_vm12, %v901_v54, %v914_v55 }
 0x2d1   :  { %1338 = vmatmul.mubr.f32.vlgmr.msra.gmra.mxu1 %v915_v57 }
 0x391   :  { %v982_v58 = vpop.f32.mrf.mxu1 }
 0x392   :  { %v986_v59 = vmul.f32 %v982_v58, %v982_v58  ;;  %v996_v20 = vrot.slane %v982_v58, %v536_v19 }
 0x393   :  { %v1339_v60 = vpop.f32.mrf.mxu1 }
 0x394   :  { %v988_v61 = vrot.slane %v986_v59, 7  ;;  %v997_v25 = vsub.f32 %v879_v11, %v996_v20  ;;  %v998_v26 = vsub.f32 %v882_v9, %v996_v20  ;;  %v999_v30 = vsub.f32 %v887_v0, %v996_v20 }
 0x395   :  { %v1000_v47 = vsub.f32 %v890_v40, %v996_v20 }
 0x396   :  { %v990_v62 = vsub.f32 %v982_v58, %v988_v61 }
 0x398   :  { %v991_v18 = vadd.f32 1e-05, %v990_v62 }
 0x39a   :  { %1393 = vrsqrt.f32 %v991_v18 }
 0x3a7   :  { %v1394_v23 = vpop.eup %1393 }
 0x3a8   :  { %v1008_v24 = vmul.f32 %v1394_v23, %v1118_v21 }
 0x3aa   :  { %v1012_v53 = vrot.slane %v1008_v24, %v552_v22 }
 0x3ac   :  { %v1013_v63 = vmul.f32 %v1012_v53, %v997_v25  ;;  %v1014_v1 = vmul.f32 %v1012_v53, %v998_v26  ;;  %v1015_v19 = vmul.f32 %v1012_v53, %v999_v30  ;;  %v1016_v2 = vmul.f32 %v1012_v53, %v1000_v47 }
 0x3ae   :  { %v1024_v3 = vadd.f32 %v1119_v56, %v1013_v63  ;;  %v1025_v4 = vadd.f32 %v1119_v56, %v1014_v1  ;;  %v1026_v5 = vadd.f32 %v1119_v56, %v1015_v19  ;;  %v1027_v6 = vadd.f32 %v1119_v56, %v1016_v2 }
 0x3b0   :  { %v1028_v7 = vadd.f32 %v1024_v3, %v1515_v27  ;;  %v1029_v8 = vadd.f32 %v1025_v4, %v1520_v28  ;;  %v1030_v9 = vadd.f32 %v1026_v5, %v1545_v37  ;;  %v1031_v13 = vadd.f32 %v1027_v6, %v1525_v29 }
 0x3b2   :  { %v1032_v22 = vmax.f32 %v1028_v7, 0.0  ;;  %v1033_v10 = vmax.f32 %v1029_v8, 0.0  ;;  %v1034_v11 = vmax.f32 %v1030_v9, 0.0  ;;  %v1035_v12 = vmax.f32 %v1031_v13, 0.0 }
 0x3b4   :  { %1036 = vst [vmem:[%s1921_s8] sm:$0xff] %v1032_v22  ;;  %1037 = vst [vmem:[%s1921_s8 + $0x8] sm:$0xff] %v1033_v10 }
 0x3b5   :  { %1038 = vst [vmem:[%s1921_s8 + $0x10] sm:$0xff] %v1034_v11  ;;  %1039 = vst [vmem:[%s1921_s8 + $0x18] sm:$0xff] %v1035_v12 }

</bundles_post_ra>
